<compile_context>
chip_gen: v6e
topology: v6e:2x2x1
jax: 0.10.0
libtpu: 0.0.40
codegen_flags: <defaults>
</compile_context>

<pallas_src>
import functools

import jax
import jax.numpy as jnp
from jax.experimental import pallas as pl
from jax.experimental.pallas import tpu as pltpu

BN_EPS = 1e-5

# Problems with fewer MACs than this go through a plain fused-XLA fast path: at that
# size the Pallas kernel is pure launch/pipeline overhead plus padding waste.
_FAST_PATH_MACS = 1 << 21

# Scoped-VMEM limit: well above our worst-case tile footprint (~10 MiB including
# double buffers), below the v7x per-TC physical budget (64 MiB), and lifts v5e's
# 16 MiB scoped default.
_VMEM_LIMIT_BYTES = 48 * 1024 * 1024


def _round_up(x, m):
    return (x + m - 1) // m * m


def _pick_tile(dim, pref, align):
    """Largest tile (multiple of `align`, <= pref) whose padding overhead is <= 12.5%.

    Returns (tile, padded_dim) with padded_dim % tile == 0.  If the whole (aligned)
    dimension fits under `pref`, use a single full-extent tile (zero extra padding).
    """
    pref = max(align, pref // align * align)
    d_min = _round_up(dim, align)
    if d_min <= pref:
        return d_min, d_min
    slack = d_min + d_min // 8
    t = pref
    while t >= align:
        pad = _round_up(dim, t)
        if pad <= slack:
            return t, pad
        t -= align
    return align, d_min


def _two_tensorcores():
    """Best-effort check for a 2-TensorCore-per-chip part (v7x)."""
    try:
        kind = jax.devices()[0].device_kind.lower()
    except Exception:  # pragma: no cover - defensive; default to 1 TC
        return False
    return "v7" in kind or "7x" in kind


def _fused_linear_bn_relu_kernel(x_ref, w_ref, shift_ref, o_ref):
    """One (tm, tn) output tile; K is the last ('arbitrary') grid axis.

    The output block is VMEM-resident across the K axis (its index_map ignores k),
    so we accumulate directly into o_ref in f32 — no scratch accumulator needed.
    """
    k = pl.program_id(2)
    partial = jnp.dot(x_ref[...], w_ref[...], preferred_element_type=jnp.float32)

    @pl.when(k == 0)
    def _init():
        o_ref[...] = partial

    @pl.when(k > 0)
    def _accum():
        o_ref[...] += partial

    @pl.when(k == pl.num_programs(2) - 1)
    def _finalize():
        # Folded bias/BN/affine shift + ReLU, all in f32 (v5e has no bf16 VPU).
        # (Output stays f32; a bf16 output would need a separate f32 accumulator.)
        o_ref[...] = jnp.maximum(o_ref[...] + shift_ref[...], 0.0)


def _forward_impl(x, w_c, shift_p, *, n, comp_dtype, tm_pref, tn, tk, force_pallas):
    """x: [M, K] f32; w_c: [K_pad, N_pad] folded weight; shift_p: [1, N_pad] f32."""
    M, K = x.shape
    K_pad, N_pad = w_c.shape
    x_c = x.astype(comp_dtype)

    if not force_pallas and M * n * K <= _FAST_PATH_MACS:
        # Tiny problem: padded MXU tiles + pipeline overhead dominate; let XLA fuse it.
        x_p = jnp.pad(x_c, ((0, 0), (0, K_pad - K)))
        y = jnp.dot(x_p, w_c, preferred_element_type=jnp.float32) + shift_p
        return jnp.maximum(y, 0.0)[:, :n]

    # tm == M_pad whenever the batch fits one tile, so the weight streams exactly once.
    tm, M_pad = _pick_tile(M, tm_pref, 8)

    # v7x has two TensorCores: make sure the parallel axes expose >= 2 blocks when the
    # batch allows, otherwise one core idles.  (Skipped on 1-TC parts: splitting M
    # would just re-stream the weight.)
    if (M_pad // tm) * (N_pad // tn) < 2 and M_pad >= 16 and _two_tensorcores():
        tm = _round_up(-(-M_pad // 2), 8)
        M_pad = _round_up(M, tm)

    x_p = jnp.pad(x_c, ((0, M_pad - M), (0, K_pad - K)))
    grid = (M_pad // tm, N_pad // tn, K_pad // tk)

    itemsize = jnp.dtype(comp_dtype).itemsize
    cost = pl.CostEstimate(
        flops=2 * M_pad * K_pad * N_pad,
        transcendentals=0,
        bytes_accessed=(M_pad * K_pad * itemsize + K_pad * N_pad * itemsize
                        + N_pad * 4 + M_pad * N_pad * 4),
    )

    out = pl.pallas_call(
        _fused_linear_bn_relu_kernel,
        out_shape=jax.ShapeDtypeStruct((M_pad, N_pad), jnp.float32),
        grid_spec=pltpu.PrefetchScalarGridSpec(
            num_scalar_prefetch=0,
            grid=grid,
            in_specs=[
                pl.BlockSpec((tm, tk), lambda i, j, k: (i, k)),   # x
                pl.BlockSpec((tk, tn), lambda i, j, k: (k, j)),   # folded weight
                pl.BlockSpec((1, tn), lambda i, j, k: (0, j)),    # folded shift
            ],
            out_specs=pl.BlockSpec((tm, tn), lambda i, j, k: (i, j)),
        ),
        compiler_params=pltpu.CompilerParams(
            dimension_semantics=("parallel", "parallel", "arbitrary"),
            vmem_limit_bytes=_VMEM_LIMIT_BYTES),
        cost_estimate=cost,
    )(x_p, w_c, shift_p)

    return out[:M, :n]


def make_basic_linear(w_t, bias, running_mean, running_var, gamma, beta, *,
                      eps=BN_EPS, use_bf16=True, tm=512, tn=512, tk=512,
                      force_pallas=False):
    """Fold the eval-mode BasicLinear parameters ONCE and return a jitted forward(x).

    w_t: [K, N] float32 (nn.Linear weight, transposed).
    bias, running_mean, running_var, gamma, beta: [N] or [1, N] float32.
    Returned callable maps x: [B, K] f32 -> [B, N] f32.
    """
    w_t = jnp.asarray(w_t, jnp.float32)
    vec = lambda v: jnp.asarray(v, jnp.float32).reshape(1, -1)
    bias, running_mean, running_var, gamma, beta = map(
        vec, (bias, running_mean, running_var, gamma, beta))
    K, N = w_t.shape

    # Fold bias + BN(running stats) + gamma/beta into a single per-feature
    # scale/shift and push the scale into the weight columns.  Done here, once:
    # in eval mode the weight and BN buffers are static, and doing this per call
    # would re-stream the full [K, N] weight through HBM several extra times.
    scale = gamma * jax.lax.rsqrt(running_var + eps)      # [1, N]
    shift = (bias - running_mean) * scale + beta          # [1, N]

    comp_dtype = jnp.bfloat16 if use_bf16 else jnp.float32

    tn, N_pad = _pick_tile(N, tn, 128)   # lane-dense, unmasked stores
    tk, K_pad = _pick_tile(K, tk, 128)

    w_c = jnp.pad((w_t * scale).astype(comp_dtype),
                  ((0, K_pad - K), (0, N_pad - N)))
    shift_p = jnp.pad(shift, ((0, 0), (0, N_pad - N)))
    w_c, shift_p = jax.block_until_ready((w_c, shift_p))   # materialize the fold once

    fwd = jax.jit(functools.partial(
        _forward_impl, n=N, comp_dtype=comp_dtype, tm_pref=tm, tn=tn, tk=tk,
        force_pallas=force_pallas))
    return lambda x: fwd(jnp.asarray(x, jnp.float32), w_c, shift_p)


def reference_forward(x, w_t, bias, running_mean, running_var, gamma, beta,
                      eps=BN_EPS):
    """Pure-JAX f32 reference matching the PyTorch eval-mode forward."""
    y = jnp.dot(x, w_t, precision=jax.lax.Precision.HIGHEST) + bias
    y = (y - running_mean) * jax.lax.rsqrt(running_var + eps)
    y = y * gamma + beta
    return jnp.maximum(y, 0.0)


if __name__ == "__main__":
    def run_case(key, B, IN_F, OUT_F, *, force_pallas):
        kx, kw, kb, km, kv, kg, kbe = jax.random.split(key, 7)
        x = jax.random.normal(kx, (B, IN_F), dtype=jnp.float32)

        # nn.Linear-style init (uniform in +-1/sqrt(in_features)).
        bound = 1.0 / jnp.sqrt(jnp.float32(IN_F))
        w = jax.random.uniform(kw, (OUT_F, IN_F), jnp.float32, -bound, bound)
        bias = jax.random.uniform(kb, (1, OUT_F), jnp.float32, -bound, bound)
        w_t = jnp.transpose(w)                                     # [K, N]

        # Non-trivial BN buffers / affine params so the scale/shift fold is exercised.
        running_mean = 0.1 * jax.random.normal(km, (1, OUT_F), jnp.float32)
        running_var = 1.0 + 0.5 * jax.random.uniform(kv, (1, OUT_F), jnp.float32)
        gamma = 1.0 + 0.1 * jax.random.normal(kg, (1, OUT_F), jnp.float32)
        beta = 0.05 * jax.random.normal(kbe, (1, OUT_F), jnp.float32)

        fwd = make_basic_linear(w_t, bias, running_mean, running_var, gamma, beta,
                                force_pallas=force_pallas)
        out = jax.block_until_ready(fwd(x))
        assert out.shape == (B, OUT_F)

        # 1) Check against a reference that uses the same bf16-quantized operands
        #    (only accumulation-order differences remain).
        scale = gamma * jax.lax.rsqrt(running_var + BN_EPS)
        shift = (bias - running_mean) * scale + beta
        x_q = x.astype(jnp.bfloat16).astype(jnp.float32)
        w_q = (w_t * scale).astype(jnp.bfloat16).astype(jnp.float32)
        ref_matched = jnp.maximum(
            jnp.dot(x_q, w_q, precision=jax.lax.Precision.HIGHEST) + shift, 0.0)
        assert jnp.allclose(out, ref_matched, atol=1e-3, rtol=1e-3)

        # 2) Check against the full-precision f32 reference (loose tolerance for the
        #    bf16 MXU inputs).
        ref_f32 = reference_forward(x, w_t, bias, running_mean, running_var,
                                    gamma, beta)
        assert jnp.allclose(out, ref_f32, atol=3e-2, rtol=3e-2)
        return out

    key = jax.random.PRNGKey(0)
    k1, k2 = jax.random.split(key)

    # Module-representative small shapes (batch=8, in=32, out=64): force the Pallas
    # path so the kernel itself is exercised, then check the XLA fast path agrees.
    out_pallas = run_case(k1, 8, 32, 64, force_pallas=True)
    out_fast = run_case(k1, 8, 32, 64, force_pallas=False)
    assert jnp.allclose(out_pallas, out_fast, atol=1e-3, rtol=1e-3)

    # Larger case: multi-block grid, padded K (320->384), non-square tiles, and the
    # hoisted one-time weight fold.
    run_case(k2, 192, 320, 640, force_pallas=False)

    print("KERNEL_OK")
</pallas_src>

<mosaic_0001>
module attributes {stable_mosaic.version = 11 : i64} {
  func.func @_fused_linear_bn_relu_kernel(%arg0: i32, %arg1: i32, %arg2: i32, %arg3: memref<8x128xbf16, #tpu.memory_space<vmem>>, %arg4: memref<128x128xbf16, #tpu.memory_space<vmem>>, %arg5: memref<1x128xf32, #tpu.memory_space<vmem>>, %arg6: memref<8x128xf32, #tpu.memory_space<vmem>>) attributes {dimension_semantics = [#tpu.dimension_semantics<parallel>, #tpu.dimension_semantics<parallel>, #tpu.dimension_semantics<arbitrary>], iteration_bounds = array<i64: 1, 1, 1>, scalar_prefetch = 0 : i64, scratch_operands = 0 : i64, tpu.core_type = #tpu.core_type<tc>, window_params = [{transform_indices = @transform_0, window_bounds = array<i64: 8, 128>}, {transform_indices = @transform_1, window_bounds = array<i64: 128, 128>}, {transform_indices = @transform_2, window_bounds = array<i64: 1, 128>}, {transform_indices = @transform_3, window_bounds = array<i64: 8, 128>}]} {
    %c0 = arith.constant 0 : index
    %c0_0 = arith.constant 0 : index
    %0 = vector.load %arg3[%c0, %c0_0] : memref<8x128xbf16, #tpu.memory_space<vmem>>, vector<8x128xbf16>
    %c0_1 = arith.constant 0 : index
    %c0_2 = arith.constant 0 : index
    %1 = vector.load %arg4[%c0_1, %c0_2] : memref<128x128xbf16, #tpu.memory_space<vmem>>, vector<128x128xbf16>
    %cst = arith.constant dense<0.000000e+00> : vector<8x128xf32>
    %2 = tpu.matmul %0, %1, %cst {dimension_numbers = #tpu.dot_dimension_numbers<[1], [0], [0], [1], [0, 0, 1, 1], [], []>} : vector<8x128xbf16>, vector<128x128xbf16>, vector<8x128xf32> -> vector<8x128xf32>
    %c0_i32 = arith.constant 0 : i32
    %3 = arith.cmpi eq, %arg2, %c0_i32 : i32
    %4 = arith.extui %3 : i1 to i32
    %c0_i32_3 = arith.constant 0 : i32
    %5 = arith.cmpi ne, %4, %c0_i32_3 : i32
    scf.if %5 {
      %c0_8 = arith.constant 0 : index
      %c0_9 = arith.constant 0 : index
      %12 = vector.load %arg6[%c0_8, %c0_9] : memref<8x128xf32, #tpu.memory_space<vmem>>, vector<8x128xf32>
      tpu.vector_store %arg6[%c0_8, %c0_9], %2 {strides = array<i32>} : memref<8x128xf32, #tpu.memory_space<vmem>>, vector<8x128xf32>,
    } else {
    }
    %c0_i32_4 = arith.constant 0 : i32
    %6 = arith.cmpi sgt, %arg2, %c0_i32_4 : i32
    %7 = arith.extui %6 : i1 to i32
    %c0_i32_5 = arith.constant 0 : i32
    %8 = arith.cmpi ne, %7, %c0_i32_5 : i32
    scf.if %8 {
      %c0_8 = arith.constant 0 : index
      %c0_9 = arith.constant 0 : index
      %12 = vector.load %arg6[%c0_8, %c0_9] : memref<8x128xf32, #tpu.memory_space<vmem>>, vector<8x128xf32>
      %13 = arith.addf %12, %2 : vector<8x128xf32>
      %c0_10 = arith.constant 0 : index
      %c0_11 = arith.constant 0 : index
      %14 = vector.load %arg6[%c0_10, %c0_11] : memref<8x128xf32, #tpu.memory_space<vmem>>, vector<8x128xf32>
      tpu.vector_store %arg6[%c0_10, %c0_11], %13 {strides = array<i32>} : memref<8x128xf32, #tpu.memory_space<vmem>>, vector<8x128xf32>,
    } else {
    }
    %c0_i32_6 = arith.constant 0 : i32
    %9 = arith.cmpi eq, %arg2, %c0_i32_6 : i32
    %10 = arith.extui %9 : i1 to i32
    %c0_i32_7 = arith.constant 0 : i32
    %11 = arith.cmpi ne, %10, %c0_i32_7 : i32
    scf.if %11 {
      %c0_8 = arith.constant 0 : index
      %c0_9 = arith.constant 0 : index
      %12 = vector.load %arg6[%c0_8, %c0_9] : memref<8x128xf32, #tpu.memory_space<vmem>>, vector<8x128xf32>
      %c0_10 = arith.constant 0 : index
      %c0_11 = arith.constant 0 : index
      %13 = vector.load %arg5[%c0_10, %c0_11] : memref<1x128xf32, #tpu.memory_space<vmem>>, vector<1x128xf32>
      %14 = vector.broadcast %13 : vector<1x128xf32> to vector<8x128xf32>
      %15 = arith.addf %12, %14 : vector<8x128xf32>
      %cst_12 = arith.constant 0.000000e+00 : f32
      %16 = vector.broadcast %cst_12 : f32 to vector<8x128xf32>
      %17 = arith.maximumf %15, %16 : vector<8x128xf32>
      %c0_13 = arith.constant 0 : index
      %c0_14 = arith.constant 0 : index
      %18 = vector.load %arg6[%c0_13, %c0_14] : memref<8x128xf32, #tpu.memory_space<vmem>>, vector<8x128xf32>
      tpu.vector_store %arg6[%c0_13, %c0_14], %17 {strides = array<i32>} : memref<8x128xf32, #tpu.memory_space<vmem>>, vector<8x128xf32>,
    } else {
    }
    return
  }
  func.func @transform_0(%arg0: i32, %arg1: i32, %arg2: i32) -> (i32, i32) {
    %c0_i32 = arith.constant 0 : i32
    return %arg0, %arg2 : i32, i32
  }
  func.func @transform_1(%arg0: i32, %arg1: i32, %arg2: i32) -> (i32, i32) {
    %c0_i32 = arith.constant 0 : i32
    return %arg2, %arg1 : i32, i32
  }
  func.func @transform_2(%arg0: i32, %arg1: i32, %arg2: i32) -> (i32, i32) {
    %c0_i32 = arith.constant 0 : i32
    %c0_i32_0 = arith.constant 0 : i32
    return %c0_i32, %arg1 : i32, i32
  }
  func.func @transform_3(%arg0: i32, %arg1: i32, %arg2: i32) -> (i32, i32) {
    %c0_i32 = arith.constant 0 : i32
    return %arg0, %arg1 : i32, i32
  }
}

</mosaic_0001>

<bundles_post_ra>
// kernel: _forward_impl.1
= control target key start
LH: loop header
LB: loop body
LE: loop exit
PB: predicated region body
PF: predicated region fallthrough
CT: control target
= control target key end

     0   :  { %8 = vsyncpa [#allocation3], 0  ;;  %s310_s0 = inlined_call_operand.vmem [shape: bf16[8,128], index: 0, kind: input, shape index: {}]   ;;  %s311_s1 = inlined_call_operand.hbm [shape: bf16[128,128], index: 1, kind: input, shape index: {}]   ;;  %s312_s2 = inlined_call_operand.vmem [shape: f32[1,128], index: 2, kind: input, shape index: {}]   ;;  %s313_s3 = inlined_call_operand.hbm [shape: f32[8,128], index: 3, kind: output, shape index: {}]  }
   0x1   :  { %9 = vsyncpa [#allocation4], 0  ;;  %s272_s12 = smov [#allocation2]  }
   0x2   :  { %s17_s13 = sshll.u32 %s272_s12, 4  ;;  %s18_s13 = int_to_ptr.vmem [resolvable:$true] %s17_s13 }
   0x3   :  { %s236_s14 = scalar_lea.vmem %s18_s13, 1024  ;;  %p241_p1 = scmp.lt.s32.totalorder %s18_s13, %s18_s13 }
   0x4   :  { %p237_p0 = scmp.ne.s32.totalorder %s18_s13, %s236_s14  ;;  %p242_p2 = scmp.lt.s32.totalorder %s236_s14, %s236_s14 }
   0x6   :  { %p243_p3 = por %p242_p2, %p241_p1 }
   0x8   :  { %p244_p4 = pnand %p243_p3, %p237_p0 }
   0xa   :  { %247 = shalt.err (!%p244_p4)
}
   0xb   :  { %s273_s15 = smov 64   ;;  %s274_s16 = smov 4  }
   0xc   :  { %23 = dma.hbm_to_vmem [thread:$0]  %s311_s1, 1024, %s18_s13, [#allocation3], %s273_s15, %s273_s15, %s274_s16  }
   0xd   :  { %268 = dma.done.wait [#allocation3], 1024  }
   0xe   :  { %269 = vsyncadd [#allocation3], 4294966272  ;;  %v275_v0 = vmov 0.0   ;;  %vm276_vm0 = vmmov 0   ;;  %v220_v1 = vld [vmem:[#allocation2 + $0x38] sm:$0xff]   ;;  %v221_v2 = vld [vmem:[#allocation2 + $0x30] sm:$0xff]  }
   0xf   :  { %194 = vmatprep.subr.bf16.mxu0 %v275_v0  ;;  %210 = vmatprep.mubr.msk.bf16.mxu0 %vm276_vm0, %v275_v0  ;;  %v222_v3 = vld [vmem:[#allocation2 + $0x28] sm:$0xff]   ;;  %v223_v4 = vld [vmem:[#allocation2 + $0x20] sm:$0xff]   ;;  %v224_v5 = vld [vmem:[#allocation2 + $0x18] sm:$0xff]   ;;  %s277_s22 = smov [#allocation5]  }
  0x10   :  { %195 = vmatpush3.bf16.msra.mxu0 %v220_v1  ;;  %v225_v6 = vld [vmem:[#allocation2 + $0x10] sm:$0xff]   ;;  %v226_v7 = vld [vmem:[#allocation2 + $0x8] sm:$0xff]   ;;  %v227_v8 = vld [vmem:[#allocation2] sm:$0xff]   ;;  %s167_s23 = sshll.u32 %s277_s22, 4  ;;  %s168_s23 = int_to_ptr.vmem [resolvable:$true] %s167_s23 }
  0x11   :  { %196 = vmatprep.subr.bf16.mxu0 %v275_v0  ;;  %v30_v9 = vld [vmem:[%s310_s0] sm:$0xf]  ;;  %s248_s24 = scalar_lea.vmem %s168_s23, 128  ;;  %p253_p6 = scmp.lt.s32.totalorder %s168_s23, %s168_s23 }
  0x12   :  { %v184_v10 = vld [vmem:[%s312_s2] ss:$0 sm:$0xff]  ;;  %p249_p5 = scmp.ne.s32.totalorder %s168_s23, %s248_s24  ;;  %p254_p7 = scmp.lt.s32.totalorder %s248_s24, %s248_s24 }
  0x14   :  { %197 = vmatpush3.bf16.msra.mxu0 %v221_v2  ;;  %p255_p8 = por %p254_p7, %p253_p6 }
  0x15   :  { %198 = vmatprep.subr.bf16.mxu0 %v275_v0 }
  0x16   :  { %p256_p9 = pnand %p255_p8, %p249_p5 }
  0x18   :  { %199 = vmatpush3.bf16.msra.mxu0 %v222_v3 }
  0x19   :  { %200 = vmatprep.subr.bf16.mxu0 %v275_v0 }
  0x1c   :  { %201 = vmatpush3.bf16.msra.mxu0 %v223_v4 }
  0x1d   :  { %202 = vmatprep.subr.bf16.mxu0 %v275_v0 }
  0x20   :  { %203 = vmatpush3.bf16.msra.mxu0 %v224_v5 }
  0x21   :  { %204 = vmatprep.subr.bf16.mxu0 %v275_v0 }
  0x24   :  { %205 = vmatpush3.bf16.msra.mxu0 %v225_v6 }
  0x25   :  { %206 = vmatprep.subr.bf16.mxu0 %v275_v0 }
  0x28   :  { %207 = vmatpush3.bf16.msra.mxu0 %v226_v7 }
  0x29   :  { %208 = vmatprep.subr.bf16.mxu0 %v275_v0 }
  0x2c   :  { %209 = vmatpush3.bf16.msra.mxu0 %v227_v8 }
  0x2f   :  { %211 = vmatmul.mubr.bf16.vlgmr.msra.gmra.mxu0 %v30_v9 }
  0xef   :  { %v129_v11 = vpop.f32.mrf.mxu0 }
  0xf0   :  { %v158_v12 = vadd.f32 %v184_v10, %v129_v11 }
  0xf1   :  { %v212_v13 = vpop.f32.mrf.mxu0 }
  0xf2   :  { %v159_v14 = vmax.f32 %v158_v12, 0.0 }
  0xf3   :  { %v132_v15 = vpop.f32.mrf.mxu0 }
  0xf4   :  { %160 = vst [vmem:[#allocation5] sm:$0xff] %v159_v14 }
  0xf5   :  { %v213_v16 = vpop.f32.mrf.mxu0 }
  0xf6   :  { %259 = shalt.err (!%p256_p9)
}
  0xf7   :  { %170 = dma.vmem_to_hbm [thread:$0]  %s168_s23, 128, %s313_s3, [#allocation4]  }
  0xf8   :  { %270 = dma.done.wait [#allocation4], 128  }
  0xf9   :  { %271 = vsyncadd [#allocation4], 4294967168 }
  0xfa   :  { %174 = vsyncpa [#allocation3], 1 }
  0xfb   :  { %175 = vsyncpa [#allocation4], 1 }

</bundles_post_ra>
